<compile_context>
chip_gen: v7x
topology: tpu7x:2x2x1
jax: 0.10.0
libtpu: 0.0.40
codegen_flags: <defaults>
</compile_context>

<pallas_src>
import math

import jax
import jax.numpy as jnp
from jax.experimental import pallas as pl
from jax.experimental.pallas import tpu as pltpu

KH = KW = 3   # kernel size; padding=1 in the PyTorch module -> SAME conv
NGATES = 4    # gate order: 0=f, 1=i, 2=o, 3=j


# --------------------------------------------------------------------------
# In-kernel im2col: scatter the 9 shifted 3x3 taps of `src` (C, H*W) into rows
# [base_row, base_row + 9*C) of the (already zero-filled) patch scratch.
# A spatial shift (dy, dx) is a static lane-window copy by dy*W + dx; the
# horizontal edge columns are masked on the source so nothing wraps across
# rows, and out-of-image rows stay zero from the scratch zero-fill.
# --------------------------------------------------------------------------
def _im2col_into(patch_ref, src, base_row, C, H, W):
    HW = H * W
    xcol = jax.lax.broadcasted_iota(jnp.int32, (1, HW), 1) % W
    src_by_dx = {
        -1: jnp.where(xcol <= W - 2, src, 0.0),
        0: src,
        1: jnp.where(xcol >= 1, src, 0.0),
    }
    for ky in range(KH):
        for kx in range(KW):
            dy, dx = ky - 1, kx - 1
            s = dy * W + dx                       # flat source offset of tap
            src_m = src_by_dx[dx]
            src0, dst0 = max(0, s), max(0, -s)
            L = HW - abs(s)
            r0 = base_row + (ky * KW + kx) * C
            patch_ref[r0:r0 + C, dst0:dst0 + L] = src_m[:, src0:src0 + L]


# --------------------------------------------------------------------------
# Pallas kernels
# --------------------------------------------------------------------------
def _make_step_kernel(H, W, Cin, Cout):
    """Full ConvLSTM cell update (h and c provided)."""
    def kernel(x_ref, h_ref, c_ref, w_ref, b_ref, h_out_ref, c_out_ref,
               patch_ref):
        # Zero-fill realises the SAME-conv zero padding.  Done every grid step
        # (with a "parallel" grid each core owns its own scratch instance).
        patch_ref[...] = jnp.zeros_like(patch_ref)
        _im2col_into(patch_ref, x_ref[0], 0, Cin, H, W)
        _im2col_into(patch_ref, h_ref[0], KH * KW * Cin, Cout, H, W)

        # One fused MXU matmul: (4*Cout, K) @ (K, H*W), K = 9*(Cin+Cout).
        gates = jnp.dot(w_ref[...], patch_ref[...].astype(w_ref.dtype),
                        preferred_element_type=jnp.float32) + b_ref[...]

        f = jax.nn.sigmoid(gates[0 * Cout:1 * Cout])
        i = jax.nn.sigmoid(gates[1 * Cout:2 * Cout])
        o = jax.nn.sigmoid(gates[2 * Cout:3 * Cout])
        j = jnp.tanh(gates[3 * Cout:4 * Cout])

        c_new = f * c_ref[0] + i * j
        h_new = o * jnp.tanh(c_new)

        h_out_ref[0] = h_new.astype(h_out_ref.dtype)
        c_out_ref[0] = c_new.astype(c_out_ref.dtype)

    return kernel


def _make_init_kernel(H, W, Cin, Cout):
    """Initial step (h is None and c is None): x-convs only, gates i/o/j."""
    def kernel(x_ref, w_ref, b_ref, h_out_ref, c_out_ref, patch_ref):
        patch_ref[...] = jnp.zeros_like(patch_ref)
        _im2col_into(patch_ref, x_ref[0], 0, Cin, H, W)

        gates = jnp.dot(w_ref[...], patch_ref[...].astype(w_ref.dtype),
                        preferred_element_type=jnp.float32) + b_ref[...]

        i = jax.nn.sigmoid(gates[0 * Cout:1 * Cout])
        o = jax.nn.sigmoid(gates[1 * Cout:2 * Cout])
        j = jnp.tanh(gates[2 * Cout:3 * Cout])

        c_new = i * j
        h_new = o * c_new          # module uses h = o * c (no tanh) here

        h_out_ref[0] = h_new.astype(h_out_ref.dtype)
        c_out_ref[0] = c_new.astype(c_out_ref.dtype)

    return kernel


# --------------------------------------------------------------------------
# pallas_call wrappers (jitted; reshapes NCHW <-> (B, C, H*W) are free)
# --------------------------------------------------------------------------
@jax.jit
def _convlstm_step(w, b, x_nchw, h_nchw, c_nchw):
    B, Cin, H, W = x_nchw.shape
    Cout = c_nchw.shape[1]
    HW = H * W
    K = KH * KW * (Cin + Cout)

    x = x_nchw.reshape(B, Cin, HW).astype(jnp.float32)
    h = h_nchw.reshape(B, Cout, HW).astype(jnp.float32)
    c = c_nchw.reshape(B, Cout, HW).astype(jnp.float32)

    grid_spec = pltpu.PrefetchScalarGridSpec(
        num_scalar_prefetch=0,
        grid=(B,),
        in_specs=[
            pl.BlockSpec((1, Cin, HW), lambda bb: (bb, 0, 0)),     # x
            pl.BlockSpec((1, Cout, HW), lambda bb: (bb, 0, 0)),    # h
            pl.BlockSpec((1, Cout, HW), lambda bb: (bb, 0, 0)),    # c
            pl.BlockSpec((NGATES * Cout, K), lambda bb: (0, 0)),   # packed W (bf16)
            pl.BlockSpec((NGATES * Cout, 1), lambda bb: (0, 0)),   # packed bias
        ],
        out_specs=(
            pl.BlockSpec((1, Cout, HW), lambda bb: (bb, 0, 0)),    # h_new
            pl.BlockSpec((1, Cout, HW), lambda bb: (bb, 0, 0)),    # c_new
        ),
        scratch_shapes=[pltpu.VMEM((K, HW), jnp.float32)],         # im2col patch
    )

    h_new, c_new = pl.pallas_call(
        _make_step_kernel(H, W, Cin, Cout),
        out_shape=(jax.ShapeDtypeStruct((B, Cout, HW), jnp.float32),
                   jax.ShapeDtypeStruct((B, Cout, HW), jnp.float32)),
        grid_spec=grid_spec,
        input_output_aliases={1: 0, 2: 1},   # h -> h_new, c -> c_new (in place)
        compiler_params=pltpu.CompilerParams(
            dimension_semantics=("parallel",)),
    )(x, h, c, w, b)

    return h_new.reshape(B, Cout, H, W), c_new.reshape(B, Cout, H, W)


@jax.jit
def _convlstm_init(w, b, x_nchw):
    B, Cin, H, W = x_nchw.shape
    Cout = b.shape[0] // 3
    HW = H * W
    K = KH * KW * Cin

    x = x_nchw.reshape(B, Cin, HW).astype(jnp.float32)

    grid_spec = pltpu.PrefetchScalarGridSpec(
        num_scalar_prefetch=0,
        grid=(B,),
        in_specs=[
            pl.BlockSpec((1, Cin, HW), lambda bb: (bb, 0, 0)),     # x
            pl.BlockSpec((3 * Cout, K), lambda bb: (0, 0)),        # packed W (i,o,j)
            pl.BlockSpec((3 * Cout, 1), lambda bb: (0, 0)),        # packed bias
        ],
        out_specs=(
            pl.BlockSpec((1, Cout, HW), lambda bb: (bb, 0, 0)),
            pl.BlockSpec((1, Cout, HW), lambda bb: (bb, 0, 0)),
        ),
        scratch_shapes=[pltpu.VMEM((K, HW), jnp.float32)],
    )

    h_new, c_new = pl.pallas_call(
        _make_init_kernel(H, W, Cin, Cout),
        out_shape=(jax.ShapeDtypeStruct((B, Cout, HW), jnp.float32),
                   jax.ShapeDtypeStruct((B, Cout, HW), jnp.float32)),
        grid_spec=grid_spec,
        compiler_params=pltpu.CompilerParams(
            dimension_semantics=("parallel",)),
    )(x, w, b)

    return h_new.reshape(B, Cout, H, W), c_new.reshape(B, Cout, H, W)


# --------------------------------------------------------------------------
# Parameter packing + public forward
# --------------------------------------------------------------------------
def pack_params(wx4, bx, wh4, bh):
    """Pack per-gate HWIO conv weights into fused, lane-dense 2D matrices.

    wx4: (4, 3, 3, Cin, Cout)   x-conv weights (gate, kh, kw, ci, co)
    wh4: (4, 3, 3, Cout, Cout)  h-conv weights
    bx, bh: (4, Cout)
    Packed row = g*Cout + co; packed column = tap*C + ci, matching the im2col
    patch row order (9 x-taps first, then 9 h-taps).
    """
    G, _, _, Cin, Cout = wx4.shape
    wx_p = jnp.transpose(wx4, (0, 4, 1, 2, 3)).reshape(G * Cout, KH * KW * Cin)
    wh_p = jnp.transpose(wh4, (0, 4, 1, 2, 3)).reshape(G * Cout, KH * KW * Cout)
    return dict(
        w_step=jnp.concatenate([wx_p, wh_p], axis=1).astype(jnp.bfloat16),
        b_step=(bx + bh).reshape(G * Cout, 1).astype(jnp.float32),
        # initial step only uses gates i, o, j (indices 1, 2, 3) and bx
        w_init=wx_p[Cout:].astype(jnp.bfloat16),
        b_init=bx[1:].reshape(3 * Cout, 1).astype(jnp.float32),
    )


def convlstm_forward(params, x_nchw, h_nchw=None, c_nchw=None):
    """Mirrors ConvLSTM.forward(x, h, c); NCHW in, (h, h, c) NCHW out."""
    if h_nchw is None and c_nchw is None:
        h_new, c_new = _convlstm_init(params["w_init"], params["b_init"], x_nchw)
    else:
        h_new, c_new = _convlstm_step(params["w_step"], params["b_step"],
                                      x_nchw, h_nchw, c_nchw)
    return (h_new, h_new, c_new)


# --------------------------------------------------------------------------
# Pure-JAX reference (f32, HIGHEST precision) for correctness check
# --------------------------------------------------------------------------
def _conv_ref(x_nhwc, w_hwio, b):
    y = jax.lax.conv_general_dilated(
        x_nhwc, w_hwio, window_strides=(1, 1), padding="SAME",
        dimension_numbers=("NHWC", "HWIO", "NHWC"),
        precision=jax.lax.Precision.HIGHEST)
    return y + b[None, None, None, :]


def convlstm_ref(wx4, bx, wh4, bh, x_nchw, h_nchw=None, c_nchw=None):
    x = jnp.transpose(x_nchw, (0, 2, 3, 1)).astype(jnp.float32)
    if h_nchw is None and c_nchw is None:
        i = jax.nn.sigmoid(_conv_ref(x, wx4[1], bx[1]))
        o = jax.nn.sigmoid(_conv_ref(x, wx4[2], bx[2]))
        j = jnp.tanh(_conv_ref(x, wx4[3], bx[3]))
        c = i * j
        h = o * c
    else:
        h_in = jnp.transpose(h_nchw, (0, 2, 3, 1)).astype(jnp.float32)
        c_in = jnp.transpose(c_nchw, (0, 2, 3, 1)).astype(jnp.float32)
        f = jax.nn.sigmoid(_conv_ref(x, wx4[0], bx[0]) + _conv_ref(h_in, wh4[0], bh[0]))
        i = jax.nn.sigmoid(_conv_ref(x, wx4[1], bx[1]) + _conv_ref(h_in, wh4[1], bh[1]))
        o = jax.nn.sigmoid(_conv_ref(x, wx4[2], bx[2]) + _conv_ref(h_in, wh4[2], bh[2]))
        j = jnp.tanh(_conv_ref(x, wx4[3], bx[3]) + _conv_ref(h_in, wh4[3], bh[3]))
        c = f * c_in + i * j
        h = o * jnp.tanh(c)
    return (jnp.transpose(h, (0, 3, 1, 2)), jnp.transpose(c, (0, 3, 1, 2)))


# --------------------------------------------------------------------------
if __name__ == "__main__":
    B, Cin, Cout, H, W = 2, 4, 8, 16, 16

    key = jax.random.PRNGKey(0)
    k_wx, k_bx, k_wh, k_bh, k_x, k_h, k_c = jax.random.split(key, 7)

    # nn.Conv2d default init: U(-1/sqrt(fan_in), +1/sqrt(fan_in)).
    bound_x = 1.0 / math.sqrt(Cin * KH * KW)
    bound_h = 1.0 / math.sqrt(Cout * KH * KW)
    wx4 = jax.random.uniform(k_wx, (NGATES, KH, KW, Cin, Cout), jnp.float32,
                             -bound_x, bound_x)
    bx = jax.random.uniform(k_bx, (NGATES, Cout), jnp.float32, -bound_x, bound_x)
    wh4 = jax.random.uniform(k_wh, (NGATES, KH, KW, Cout, Cout), jnp.float32,
                             -bound_h, bound_h)
    bh = jax.random.uniform(k_bh, (NGATES, Cout), jnp.float32, -bound_h, bound_h)

    params = pack_params(wx4, bx, wh4, bh)

    x = jax.random.normal(k_x, (B, Cin, H, W), jnp.float32)
    h0 = jax.random.normal(k_h, (B, Cout, H, W), jnp.float32)
    c0 = jax.random.normal(k_c, (B, Cout, H, W), jnp.float32)

    # Full recurrent step (h, c provided).
    h1, h1_dup, c1 = convlstm_forward(params, x, h0, c0)
    jax.block_until_ready((h1, c1))

    # Initial step (h is None and c is None branch).
    hi, _, ci = convlstm_forward(params, x, None, None)
    jax.block_until_ready((hi, ci))

    # Correctness vs pure-JAX f32 conv reference.  The kernel matmul runs with
    # bf16 operands on the MXU (f32 accumulation), hence the 2e-2 tolerance.
    h1_ref, c1_ref = convlstm_ref(wx4, bx, wh4, bh, x, h0, c0)
    hi_ref, ci_ref = convlstm_ref(wx4, bx, wh4, bh, x, None, None)
    assert jnp.allclose(h1, h1_ref, atol=2e-2, rtol=2e-2), \
        float(jnp.max(jnp.abs(h1 - h1_ref)))
    assert jnp.allclose(c1, c1_ref, atol=2e-2, rtol=2e-2), \
        float(jnp.max(jnp.abs(c1 - c1_ref)))
    assert jnp.allclose(hi, hi_ref, atol=2e-2, rtol=2e-2), \
        float(jnp.max(jnp.abs(hi - hi_ref)))
    assert jnp.allclose(ci, ci_ref, atol=2e-2, rtol=2e-2), \
        float(jnp.max(jnp.abs(ci - ci_ref)))
    assert h1 is h1_dup  # forward returns (h, h, c)

    print("KERNEL_OK")
</pallas_src>

<mosaic_0001>
module attributes {stable_mosaic.version = 11 : i64} {
  func.func @kernel(%arg0: i32, %arg1: memref<1x4x256xf32, #tpu.memory_space<vmem>>, %arg2: memref<1x8x256xf32, #tpu.memory_space<vmem>>, %arg3: memref<1x8x256xf32, #tpu.memory_space<vmem>>, %arg4: memref<32x108xbf16, #tpu.memory_space<vmem>>, %arg5: memref<32x1xf32, #tpu.memory_space<vmem>>, %arg6: memref<1x8x256xf32, #tpu.memory_space<vmem>>, %arg7: memref<1x8x256xf32, #tpu.memory_space<vmem>>, %arg8: memref<108x256xf32, #tpu.memory_space<vmem>>) attributes {dimension_semantics = [#tpu.dimension_semantics<parallel>], iteration_bounds = array<i64: 2>, scalar_prefetch = 0 : i64, scratch_operands = 1 : i64, tpu.core_type = #tpu.core_type<tc>, window_params = [{transform_indices = @transform_0, window_bounds = array<i64: 1, 4, 256>}, {transform_indices = @transform_1, window_bounds = array<i64: 1, 8, 256>}, {transform_indices = @transform_2, window_bounds = array<i64: 1, 8, 256>}, {pipeline_mode = #tpu.pipeline_mode<synchronous>, transform_indices = @transform_3, window_bounds = array<i64: 32, 108>}, {pipeline_mode = #tpu.pipeline_mode<synchronous>, transform_indices = @transform_4, window_bounds = array<i64: 32, 1>}, {transform_indices = @transform_5, window_bounds = array<i64: 1, 8, 256>}, {transform_indices = @transform_6, window_bounds = array<i64: 1, 8, 256>}]} {
    %cst = arith.constant 0.000000e+00 : f32
    %0 = vector.broadcast %cst : f32 to vector<108x256xf32>
    %c0 = arith.constant 0 : index
    %c0_0 = arith.constant 0 : index
    %1 = vector.load %arg8[%c0, %c0_0] : memref<108x256xf32, #tpu.memory_space<vmem>>, vector<108x256xf32>
    tpu.vector_store %arg8[%c0, %c0_0], %0 {strides = array<i32>} : memref<108x256xf32, #tpu.memory_space<vmem>>, vector<108x256xf32>,
    %c0_1 = arith.constant 0 : index
    %c0_2 = arith.constant 0 : index
    %c0_3 = arith.constant 0 : index
    %2 = vector.load %arg1[%c0_1, %c0_2, %c0_3] : memref<1x4x256xf32, #tpu.memory_space<vmem>>, vector<1x4x256xf32>
    %3 = vector.shape_cast %2 : vector<1x4x256xf32> to vector<4x256xf32>
    %4 = tpu.iota {dimensions = array<i32: 1>} : vector<1x256xi32>
    %c16_i32 = arith.constant 16 : i32
    %c0_i32 = arith.constant 0 : i32
    %5 = arith.cmpi eq, %c16_i32, %c0_i32 : i32
    %c1_i32 = arith.constant 1 : i32
    %6 = arith.select %5, %c1_i32, %c16_i32 : i32
    %7 = vector.broadcast %6 : i32 to vector<1x256xi32>
    %8 = arith.remsi %4, %7 : vector<1x256xi32>
    %c0_i32_4 = arith.constant 0 : i32
    %9 = vector.broadcast %c0_i32_4 : i32 to vector<1x256xi32>
    %10 = arith.cmpi ne, %8, %9 : vector<1x256xi32>
    %c0_i32_5 = arith.constant 0 : i32
    %11 = vector.broadcast %c0_i32_5 : i32 to vector<1x256xi32>
    %12 = arith.cmpi slt, %8, %11 : vector<1x256xi32>
    %c0_i32_6 = arith.constant 0 : i32
    %13 = arith.cmpi slt, %6, %c0_i32_6 : i32
    %14 = vector.broadcast %13 : i1 to vector<1x256xi1>
    %15 = vector.broadcast %14 : vector<1x256xi1> to vector<1x256xi1>
    %16 = arith.xori %12, %15 : vector<1x256xi1>
    %17 = arith.andi %16, %10 : vector<1x256xi1>
    %18 = vector.broadcast %6 : i32 to vector<1x256xi32>
    %19 = arith.addi %8, %18 : vector<1x256xi32>
    %20 = arith.select %17, %19, %8 : vector<1x256xi1>, vector<1x256xi32>
    %c14_i32 = arith.constant 14 : i32
    %21 = vector.broadcast %c14_i32 : i32 to vector<1x256xi32>
    %22 = arith.cmpi sle, %20, %21 : vector<1x256xi32>
    %cst_7 = arith.constant 0.000000e+00 : f32
    %23 = vector.shape_cast %22 : vector<1x256xi1> to vector<1x256xi1>
    %24 = vector.broadcast %23 : vector<1x256xi1> to vector<4x256xi1>
    %25 = vector.broadcast %cst_7 : f32 to vector<4x256xf32>
    %26 = arith.select %24, %3, %25 : vector<4x256xi1>, vector<4x256xf32>
    %c1_i32_8 = arith.constant 1 : i32
    %27 = vector.broadcast %c1_i32_8 : i32 to vector<1x256xi32>
    %28 = arith.cmpi sge, %20, %27 : vector<1x256xi32>
    %cst_9 = arith.constant 0.000000e+00 : f32
    %29 = vector.shape_cast %28 : vector<1x256xi1> to vector<1x256xi1>
    %30 = vector.broadcast %29 : vector<1x256xi1> to vector<4x256xi1>
    %31 = vector.broadcast %cst_9 : f32 to vector<4x256xf32>
    %32 = arith.select %30, %3, %31 : vector<4x256xi1>, vector<4x256xf32>
    %33 = vector.extract_strided_slice %26 {offsets = [0, 0], sizes = [4, 239], strides = [1, 1]} : vector<4x256xf32> to vector<4x239xf32>
    %c0_10 = arith.constant 0 : index
    %c17 = arith.constant 17 : index
    %34 = vector.load %arg8[%c0_10, %c17] : memref<108x256xf32, #tpu.memory_space<vmem>>, vector<4x239xf32>
    tpu.vector_store %arg8[%c0_10, %c17], %33 {strides = array<i32>} : memref<108x256xf32, #tpu.memory_space<vmem>>, vector<4x239xf32>,
    %35 = vector.extract_strided_slice %3 {offsets = [0, 0], sizes = [4, 240], strides = [1, 1]} : vector<4x256xf32> to vector<4x240xf32>
    %c4 = arith.constant 4 : index
    %c16 = arith.constant 16 : index
    %36 = vector.load %arg8[%c4, %c16] : memref<108x256xf32, #tpu.memory_space<vmem>>, vector<4x240xf32>
    tpu.vector_store %arg8[%c4, %c16], %35 {strides = array<i32>} : memref<108x256xf32, #tpu.memory_space<vmem>>, vector<4x240xf32>,
    %37 = vector.extract_strided_slice %32 {offsets = [0, 0], sizes = [4, 241], strides = [1, 1]} : vector<4x256xf32> to vector<4x241xf32>
    %c8 = arith.constant 8 : index
    %c15 = arith.constant 15 : index
    %38 = vector.load %arg8[%c8, %c15] : memref<108x256xf32, #tpu.memory_space<vmem>>, vector<4x241xf32>
    tpu.vector_store %arg8[%c8, %c15], %37 {strides = array<i32>} : memref<108x256xf32, #tpu.memory_space<vmem>>, vector<4x241xf32>,
    %39 = vector.extract_strided_slice %26 {offsets = [0, 0], sizes = [4, 255], strides = [1, 1]} : vector<4x256xf32> to vector<4x255xf32>
    %c12 = arith.constant 12 : index
    %c1 = arith.constant 1 : index
    %40 = vector.load %arg8[%c12, %c1] : memref<108x256xf32, #tpu.memory_space<vmem>>, vector<4x255xf32>
    tpu.vector_store %arg8[%c12, %c1], %39 {strides = array<i32>} : memref<108x256xf32, #tpu.memory_space<vmem>>, vector<4x255xf32>,
    %c16_11 = arith.constant 16 : index
    %c0_12 = arith.constant 0 : index
    %41 = vector.load %arg8[%c16_11, %c0_12] : memref<108x256xf32, #tpu.memory_space<vmem>>, vector<4x256xf32>
    tpu.vector_store %arg8[%c16_11, %c0_12], %3 {strides = array<i32>} : memref<108x256xf32, #tpu.memory_space<vmem>>, vector<4x256xf32>,
    %42 = vector.extract_strided_slice %32 {offsets = [0, 1], sizes = [4, 255], strides = [1, 1]} : vector<4x256xf32> to vector<4x255xf32>
    %c20 = arith.constant 20 : index
    %c0_13 = arith.constant 0 : index
    %43 = vector.load %arg8[%c20, %c0_13] : memref<108x256xf32, #tpu.memory_space<vmem>>, vector<4x255xf32>
    tpu.vector_store %arg8[%c20, %c0_13], %42 {strides = array<i32>} : memref<108x256xf32, #tpu.memory_space<vmem>>, vector<4x255xf32>,
    %44 = vector.extract_strided_slice %26 {offsets = [0, 15], sizes = [4, 241], strides = [1, 1]} : vector<4x256xf32> to vector<4x241xf32>
    %c24 = arith.constant 24 : index
    %c0_14 = arith.constant 0 : index
    %45 = vector.load %arg8[%c24, %c0_14] : memref<108x256xf32, #tpu.memory_space<vmem>>, vector<4x241xf32>
    tpu.vector_store %arg8[%c24, %c0_14], %44 {strides = array<i32>} : memref<108x256xf32, #tpu.memory_space<vmem>>, vector<4x241xf32>,
    %46 = vector.extract_strided_slice %3 {offsets = [0, 16], sizes = [4, 240], strides = [1, 1]} : vector<4x256xf32> to vector<4x240xf32>
    %c28 = arith.constant 28 : index
    %c0_15 = arith.constant 0 : index
    %47 = vector.load %arg8[%c28, %c0_15] : memref<108x256xf32, #tpu.memory_space<vmem>>, vector<4x240xf32>
    tpu.vector_store %arg8[%c28, %c0_15], %46 {strides = array<i32>} : memref<108x256xf32, #tpu.memory_space<vmem>>, vector<4x240xf32>,
    %48 = vector.extract_strided_slice %32 {offsets = [0, 17], sizes = [4, 239], strides = [1, 1]} : vector<4x256xf32> to vector<4x239xf32>
    %c32 = arith.constant 32 : index
    %c0_16 = arith.constant 0 : index
    %49 = vector.load %arg8[%c32, %c0_16] : memref<108x256xf32, #tpu.memory_space<vmem>>, vector<4x239xf32>
    tpu.vector_store %arg8[%c32, %c0_16], %48 {strides = array<i32>} : memref<108x256xf32, #tpu.memory_space<vmem>>, vector<4x239xf32>,
    %c0_17 = arith.constant 0 : index
    %c0_18 = arith.constant 0 : index
    %c0_19 = arith.constant 0 : index
    %50 = vector.load %arg2[%c0_17, %c0_18, %c0_19] : memref<1x8x256xf32, #tpu.memory_space<vmem>>, vector<1x8x256xf32>
    %51 = vector.shape_cast %50 : vector<1x8x256xf32> to vector<8x256xf32>
    %52 = tpu.iota {dimensions = array<i32: 1>} : vector<1x256xi32>
    %c16_i32_20 = arith.constant 16 : i32
    %c0_i32_21 = arith.constant 0 : i32
    %53 = arith.cmpi eq, %c16_i32_20, %c0_i32_21 : i32
    %c1_i32_22 = arith.constant 1 : i32
    %54 = arith.select %53, %c1_i32_22, %c16_i32_20 : i32
    %55 = vector.broadcast %54 : i32 to vector<1x256xi32>
    %56 = arith.remsi %52, %55 : vector<1x256xi32>
    %c0_i32_23 = arith.constant 0 : i32
    %57 = vector.broadcast %c0_i32_23 : i32 to vector<1x256xi32>
    %58 = arith.cmpi ne, %56, %57 : vector<1x256xi32>
    %c0_i32_24 = arith.constant 0 : i32
    %59 = vector.broadcast %c0_i32_24 : i32 to vector<1x256xi32>
    %60 = arith.cmpi slt, %56, %59 : vector<1x256xi32>
    %c0_i32_25 = arith.constant 0 : i32
    %61 = arith.cmpi slt, %54, %c0_i32_25 : i32
    %62 = vector.broadcast %61 : i1 to vector<1x256xi1>
    %63 = vector.broadcast %62 : vector<1x256xi1> to vector<1x256xi1>
    %64 = arith.xori %60, %63 : vector<1x256xi1>
    %65 = arith.andi %64, %58 : vector<1x256xi1>
    %66 = vector.broadcast %54 : i32 to vector<1x256xi32>
    %67 = arith.addi %56, %66 : vector<1x256xi32>
    %68 = arith.select %65, %67, %56 : vector<1x256xi1>, vector<1x256xi32>
    %c14_i32_26 = arith.constant 14 : i32
    %69 = vector.broadcast %c14_i32_26 : i32 to vector<1x256xi32>
    %70 = arith.cmpi sle, %68, %69 : vector<1x256xi32>
    %cst_27 = arith.constant 0.000000e+00 : f32
    %71 = vector.shape_cast %70 : vector<1x256xi1> to vector<1x256xi1>
    %72 = vector.broadcast %71 : vector<1x256xi1> to vector<8x256xi1>
    %73 = vector.broadcast %cst_27 : f32 to vector<8x256xf32>
    %74 = arith.select %72, %51, %73 : vector<8x256xi1>, vector<8x256xf32>
    %c1_i32_28 = arith.constant 1 : i32
    %75 = vector.broadcast %c1_i32_28 : i32 to vector<1x256xi32>
    %76 = arith.cmpi sge, %68, %75 : vector<1x256xi32>
    %cst_29 = arith.constant 0.000000e+00 : f32
    %77 = vector.shape_cast %76 : vector<1x256xi1> to vector<1x256xi1>
    %78 = vector.broadcast %77 : vector<1x256xi1> to vector<8x256xi1>
    %79 = vector.broadcast %cst_29 : f32 to vector<8x256xf32>
    %80 = arith.select %78, %51, %79 : vector<8x256xi1>, vector<8x256xf32>
    %81 = vector.extract_strided_slice %74 {offsets = [0, 0], sizes = [8, 239], strides = [1, 1]} : vector<8x256xf32> to vector<8x239xf32>
    %c36 = arith.constant 36 : index
    %c17_30 = arith.constant 17 : index
    %82 = vector.load %arg8[%c36, %c17_30] : memref<108x256xf32, #tpu.memory_space<vmem>>, vector<8x239xf32>
    tpu.vector_store %arg8[%c36, %c17_30], %81 {strides = array<i32>} : memref<108x256xf32, #tpu.memory_space<vmem>>, vector<8x239xf32>,
    %83 = vector.extract_strided_slice %51 {offsets = [0, 0], sizes = [8, 240], strides = [1, 1]} : vector<8x256xf32> to vector<8x240xf32>
    %c44 = arith.constant 44 : index
    %c16_31 = arith.constant 16 : index
    %84 = vector.load %arg8[%c44, %c16_31] : memref<108x256xf32, #tpu.memory_space<vmem>>, vector<8x240xf32>
    tpu.vector_store %arg8[%c44, %c16_31], %83 {strides = array<i32>} : memref<108x256xf32, #tpu.memory_space<vmem>>, vector<8x240xf32>,
    %85 = vector.extract_strided_slice %80 {offsets = [0, 0], sizes = [8, 241], strides = [1, 1]} : vector<8x256xf32> to vector<8x241xf32>
    %c52 = arith.constant 52 : index
    %c15_32 = arith.constant 15 : index
    %86 = vector.load %arg8[%c52, %c15_32] : memref<108x256xf32, #tpu.memory_space<vmem>>, vector<8x241xf32>
    tpu.vector_store %arg8[%c52, %c15_32], %85 {strides = array<i32>} : memref<108x256xf32, #tpu.memory_space<vmem>>, vector<8x241xf32>,
    %87 = vector.extract_strided_slice %74 {offsets = [0, 0], sizes = [8, 255], strides = [1, 1]} : vector<8x256xf32> to vector<8x255xf32>
    %c60 = arith.constant 60 : index
    %c1_33 = arith.constant 1 : index
    %88 = vector.load %arg8[%c60, %c1_33] : memref<108x256xf32, #tpu.memory_space<vmem>>, vector<8x255xf32>
    tpu.vector_store %arg8[%c60, %c1_33], %87 {strides = array<i32>} : memref<108x256xf32, #tpu.memory_space<vmem>>, vector<8x255xf32>,
    %c68 = arith.constant 68 : index
    %c0_34 = arith.constant 0 : index
    %89 = vector.load %arg8[%c68, %c0_34] : memref<108x256xf32, #tpu.memory_space<vmem>>, vector<8x256xf32>
    tpu.vector_store %arg8[%c68, %c0_34], %51 {strides = array<i32>} : memref<108x256xf32, #tpu.memory_space<vmem>>, vector<8x256xf32>,
    %90 = vector.extract_strided_slice %80 {offsets = [0, 1], sizes = [8, 255], strides = [1, 1]} : vector<8x256xf32> to vector<8x255xf32>
    %c76 = arith.constant 76 : index
    %c0_35 = arith.constant 0 : index
    %91 = vector.load %arg8[%c76, %c0_35] : memref<108x256xf32, #tpu.memory_space<vmem>>, vector<8x255xf32>
    tpu.vector_store %arg8[%c76, %c0_35], %90 {strides = array<i32>} : memref<108x256xf32, #tpu.memory_space<vmem>>, vector<8x255xf32>,
    %92 = vector.extract_strided_slice %74 {offsets = [0, 15], sizes = [8, 241], strides = [1, 1]} : vector<8x256xf32> to vector<8x241xf32>
    %c84 = arith.constant 84 : index
    %c0_36 = arith.constant 0 : index
    %93 = vector.load %arg8[%c84, %c0_36] : memref<108x256xf32, #tpu.memory_space<vmem>>, vector<8x241xf32>
    tpu.vector_store %arg8[%c84, %c0_36], %92 {strides = array<i32>} : memref<108x256xf32, #tpu.memory_space<vmem>>, vector<8x241xf32>,
    %94 = vector.extract_strided_slice %51 {offsets = [0, 16], sizes = [8, 240], strides = [1, 1]} : vector<8x256xf32> to vector<8x240xf32>
    %c92 = arith.constant 92 : index
    %c0_37 = arith.constant 0 : index
    %95 = vector.load %arg8[%c92, %c0_37] : memref<108x256xf32, #tpu.memory_space<vmem>>, vector<8x240xf32>
    tpu.vector_store %arg8[%c92, %c0_37], %94 {strides = array<i32>} : memref<108x256xf32, #tpu.memory_space<vmem>>, vector<8x240xf32>,
    %96 = vector.extract_strided_slice %80 {offsets = [0, 17], sizes = [8, 239], strides = [1, 1]} : vector<8x256xf32> to vector<8x239xf32>
    %c100 = arith.constant 100 : index
    %c0_38 = arith.constant 0 : index
    %97 = vector.load %arg8[%c100, %c0_38] : memref<108x256xf32, #tpu.memory_space<vmem>>, vector<8x239xf32>
    tpu.vector_store %arg8[%c100, %c0_38], %96 {strides = array<i32>} : memref<108x256xf32, #tpu.memory_space<vmem>>, vector<8x239xf32>,
    %c0_39 = arith.constant 0 : index
    %c0_40 = arith.constant 0 : index
    %98 = vector.load %arg4[%c0_39, %c0_40] : memref<32x108xbf16, #tpu.memory_space<vmem>>, vector<32x108xbf16>
    %c0_41 = arith.constant 0 : index
    %c0_42 = arith.constant 0 : index
    %99 = vector.load %arg8[%c0_41, %c0_42] : memref<108x256xf32, #tpu.memory_space<vmem>>, vector<108x256xf32>
    %100 = arith.truncf %99 : vector<108x256xf32> to vector<108x256xbf16>
    %cst_43 = arith.constant dense<0.000000e+00> : vector<32x256xf32>
    %101 = tpu.matmul %98, %100, %cst_43 {dimension_numbers = #tpu.dot_dimension_numbers<[1], [0], [0], [1], [0, 0, 1, 1], [], []>} : vector<32x108xbf16>, vector<108x256xbf16>, vector<32x256xf32> -> vector<32x256xf32>
    %c0_44 = arith.constant 0 : index
    %c0_45 = arith.constant 0 : index
    %102 = vector.load %arg5[%c0_44, %c0_45] : memref<32x1xf32, #tpu.memory_space<vmem>>, vector<32x1xf32>
    %103 = vector.broadcast %102 : vector<32x1xf32> to vector<32x256xf32>
    %104 = arith.addf %101, %103 : vector<32x256xf32>
    %105 = vector.extract_strided_slice %104 {offsets = [0, 0], sizes = [8, 256], strides = [1, 1]} : vector<32x256xf32> to vector<8x256xf32>
    %106 = arith.negf %105 : vector<8x256xf32>
    %107 = math.exp %106 : vector<8x256xf32>
    %cst_46 = arith.constant 1.000000e+00 : f32
    %108 = vector.broadcast %cst_46 : f32 to vector<8x256xf32>
    %109 = arith.addf %108, %107 : vector<8x256xf32>
    %110 = arith.divf %108, %109 : vector<8x256xf32>
    %111 = vector.extract_strided_slice %104 {offsets = [8, 0], sizes = [8, 256], strides = [1, 1]} : vector<32x256xf32> to vector<8x256xf32>
    %112 = arith.negf %111 : vector<8x256xf32>
    %113 = math.exp %112 : vector<8x256xf32>
    %cst_47 = arith.constant 1.000000e+00 : f32
    %114 = vector.broadcast %cst_47 : f32 to vector<8x256xf32>
    %115 = arith.addf %114, %113 : vector<8x256xf32>
    %116 = arith.divf %114, %115 : vector<8x256xf32>
    %117 = vector.extract_strided_slice %104 {offsets = [16, 0], sizes = [8, 256], strides = [1, 1]} : vector<32x256xf32> to vector<8x256xf32>
    %118 = arith.negf %117 : vector<8x256xf32>
    %119 = math.exp %118 : vector<8x256xf32>
    %cst_48 = arith.constant 1.000000e+00 : f32
    %120 = vector.broadcast %cst_48 : f32 to vector<8x256xf32>
    %121 = arith.addf %120, %119 : vector<8x256xf32>
    %122 = arith.divf %120, %121 : vector<8x256xf32>
    %123 = vector.extract_strided_slice %104 {offsets = [24, 0], sizes = [8, 256], strides = [1, 1]} : vector<32x256xf32> to vector<8x256xf32>
    %124 = math.tanh %123 : vector<8x256xf32>
    %c0_49 = arith.constant 0 : index
    %c0_50 = arith.constant 0 : index
    %c0_51 = arith.constant 0 : index
    %125 = vector.load %arg3[%c0_49, %c0_50, %c0_51] : memref<1x8x256xf32, #tpu.memory_space<vmem>>, vector<1x8x256xf32>
    %126 = vector.shape_cast %125 : vector<1x8x256xf32> to vector<8x256xf32>
    %127 = arith.mulf %110, %126 : vector<8x256xf32>
    %128 = arith.mulf %116, %124 : vector<8x256xf32>
    %129 = arith.addf %127, %128 : vector<8x256xf32>
    %130 = math.tanh %129 : vector<8x256xf32>
    %131 = arith.mulf %122, %130 : vector<8x256xf32>
    %c0_52 = arith.constant 0 : index
    %c0_53 = arith.constant 0 : index
    %c0_54 = arith.constant 0 : index
    %132 = vector.load %arg6[%c0_52, %c0_53, %c0_54] : memref<1x8x256xf32, #tpu.memory_space<vmem>>, vector<1x8x256xf32>
    %133 = vector.shape_cast %132 : vector<1x8x256xf32> to vector<8x256xf32>
    %134 = vector.shape_cast %131 : vector<8x256xf32> to vector<1x8x256xf32>
    tpu.vector_store %arg6[%c0_52, %c0_53, %c0_54], %134 {strides = array<i32>} : memref<1x8x256xf32, #tpu.memory_space<vmem>>, vector<1x8x256xf32>,
    %c0_55 = arith.constant 0 : index
    %c0_56 = arith.constant 0 : index
    %c0_57 = arith.constant 0 : index
    %135 = vector.load %arg7[%c0_55, %c0_56, %c0_57] : memref<1x8x256xf32, #tpu.memory_space<vmem>>, vector<1x8x256xf32>
    %136 = vector.shape_cast %135 : vector<1x8x256xf32> to vector<8x256xf32>
    %137 = vector.shape_cast %129 : vector<8x256xf32> to vector<1x8x256xf32>
    tpu.vector_store %arg7[%c0_55, %c0_56, %c0_57], %137 {strides = array<i32>} : memref<1x8x256xf32, #tpu.memory_space<vmem>>, vector<1x8x256xf32>,
    return
  }
  func.func @transform_0(%arg0: i32) -> (i32, i32, i32) {
    %c0_i32 = arith.constant 0 : i32
    %c0_i32_0 = arith.constant 0 : i32
    %c0_i32_1 = arith.constant 0 : i32
    return %arg0, %c0_i32, %c0_i32_0 : i32, i32, i32
  }
  func.func @transform_1(%arg0: i32) -> (i32, i32, i32) {
    %c0_i32 = arith.constant 0 : i32
    %c0_i32_0 = arith.constant 0 : i32
    %c0_i32_1 = arith.constant 0 : i32
    return %arg0, %c0_i32, %c0_i32_0 : i32, i32, i32
  }
  func.func @transform_2(%arg0: i32) -> (i32, i32, i32) {
    %c0_i32 = arith.constant 0 : i32
    %c0_i32_0 = arith.constant 0 : i32
    %c0_i32_1 = arith.constant 0 : i32
    return %arg0, %c0_i32, %c0_i32_0 : i32, i32, i32
  }
  func.func @transform_3(%arg0: i32) -> (i32, i32) {
    %c0_i32 = arith.constant 0 : i32
    %c0_i32_0 = arith.constant 0 : i32
    %c0_i32_1 = arith.constant 0 : i32
    return %c0_i32, %c0_i32_0 : i32, i32
  }
  func.func @transform_4(%arg0: i32) -> (i32, i32) {
    %c0_i32 = arith.constant 0 : i32
    %c0_i32_0 = arith.constant 0 : i32
    %c0_i32_1 = arith.constant 0 : i32
    return %c0_i32, %c0_i32_0 : i32, i32
  }
  func.func @transform_5(%arg0: i32) -> (i32, i32, i32) {
    %c0_i32 = arith.constant 0 : i32
    %c0_i32_0 = arith.constant 0 : i32
    %c0_i32_1 = arith.constant 0 : i32
    return %arg0, %c0_i32, %c0_i32_0 : i32, i32, i32
  }
  func.func @transform_6(%arg0: i32) -> (i32, i32, i32) {
    %c0_i32 = arith.constant 0 : i32
    %c0_i32_0 = arith.constant 0 : i32
    %c0_i32_1 = arith.constant 0 : i32
    return %arg0, %c0_i32, %c0_i32_0 : i32, i32, i32
  }
}

</mosaic_0001>

<bundles_post_ra>
// kernel: _convlstm_step.1
= control target key start
LH: loop header
LB: loop body
LE: loop exit
PB: predicated region body
PF: predicated region fallthrough
CT: control target
= control target key end

     0   :  { %s1069_s21 = smov 0   ;;  %s1209_s0 = inlined_call_operand.vmem [shape: f32[2,4,256], index: 0, kind: input, shape index: {}]   ;;  %s1210_s1 = inlined_call_operand.vmem [shape: f32[2,8,256], index: 1, kind: input, shape index: {}, may-alias: {1,5}]   ;;  %s1211_s2 = inlined_call_operand.vmem [shape: f32[2,8,256], index: 2, kind: input, shape index: {}, may-alias: {2,6}]   ;;  %s1212_s3 = inlined_call_operand.vmem [shape: bf16[32,108], index: 3, kind: input, shape index: {}]   ;;  %s1213_s4 = inlined_call_operand.vmem [shape: f32[32,1], index: 4, kind: input, shape index: {}]   ;;  %s1214_s5 = inlined_call_operand.vmem [shape: f32[2,8,256], index: 5, kind: output, shape index: {0}, may-alias: {1,5}]   ;;  %s1215_s6 = inlined_call_operand.vmem [shape: f32[2,8,256], index: 6, kind: output, shape index: {1}, may-alias: {2,6}]  }
   0x1 LB: > { %s913_s22 = sadd.s32 4294967295, %s1022_s21   ;;  %p917_p0 = scmp.ge.s32.totalorder %s1022_s21, 1  ;;  %s1022_s21 = sphi %s1069_s21, %s17_s21  }
   0x2   : > { %p235_p1 = scmp.lt.s32.totalorder %s1022_s21, 3 }
   0x4   : > { %p236_p2 = pnand %p917_p0, %p235_p1 }
   0x5   : > { %p1079_p3 = scmp.lt.s32.totalorder (!%p236_p2), %s913_s22, 1  ;;  %v335_v0 = vlaneseq (!%p236_p2)  ;;  %v1024_v1 = vmov (!%p236_p2), 0.0   ;;  %s1025_s29 = smov (!%p236_p2), 16   ;;  %v1033_v33 = vmov (!%p236_p2), 0   ;;  %v646_v34 = vld [vmem:[%s1213_s4] sm:$0xff] (!%p236_p2)  ;;  %v647_v35 = vld [vmem:[%s1213_s4 + $0x8] sm:$0xff] (!%p236_p2) }
   0x6   : > { %239 = sbr.rel (%p236_p2) target bundleno = 470 (0x1d6), region = 40  ;;  %306 = vst [vmem:[#allocation2] sm:$0xff] (!%p236_p2), %v1024_v1  ;;  %307 = vst [vmem:[#allocation2 + $0x8] sm:$0xff] (!%p236_p2), %v1024_v1  ;;  %s1026_s9 = smov (!%p236_p2), 17   ;;  %726 = vmatprep.mubr.bf16.mxu0 (!%p236_p2), %v1033_v33  ;;  %736 = vmatprep.mubr.bf16.mxu1 (!%p236_p2), %v1033_v33  ;;  %v648_v36 = vld [vmem:[%s1213_s4 + $0x10] sm:$0xff] (!%p236_p2)  ;;  %v649_v37 = vld [vmem:[%s1213_s4 + $0x18] sm:$0xff] (!%p236_p2) }
   0x7   : > { %308 = vst [vmem:[#allocation2 + $0x10] sm:$0xff] (!%p236_p2), %v1024_v1  ;;  %309 = vst [vmem:[#allocation2 + $0x18] sm:$0xff] (!%p236_p2), %v1024_v1  ;;  %v336_v2 = vand.u32 (!%p236_p2), 127, %v335_v0  ;;  %s1027_s10 = smov (!%p236_p2), 15   ;;  %s1028_s11 = smov (!%p236_p2), 1   ;;  %979 = vset.pattern.permute.xlu1 (!%p236_p2), %v1033_v33  ;;  %978 = vset.pattern.permute.xlu0 (!%p236_p2), %v1033_v33  ;;  %vm391_vm4 = vcmask (!%p236_p2), 1043592  }
   0x8   : > { %310 = vst [vmem:[#allocation2 + $0x20] sm:$0xff] (!%p236_p2), %v1024_v1  ;;  %311 = vst [vmem:[#allocation2 + $0x28] sm:$0xff] (!%p236_p2), %v1024_v1  ;;  %s1029_s12 = smov (!%p236_p2), 127   ;;  %s1030_s13 = smov (!%p236_p2), 113   ;;  %vm399_vm5 = vcmask (!%p236_p2), 130048   ;;  %vm403_vm6 = vcmask (!%p236_p2), 1047684  }
   0x9   : > { %312 = vst [vmem:[#allocation2 + $0x30] sm:$0xff] (!%p236_p2), %v1024_v1  ;;  %313 = vst [vmem:[#allocation2 + $0x38] sm:$0xff] (!%p236_p2), %v1024_v1  ;;  %v342_v3 = vand.u32 (!%p236_p2), 15, %v336_v2  ;;  %v337_v4 = vadd.s32 (!%p236_p2), 128, %v336_v2  ;;  %s1031_s14 = smov (!%p236_p2), 112   ;;  %s1032_s15 = smov (!%p236_p2), 111  }
   0xa   : > { %314 = vst [vmem:[#allocation2 + $0x40] sm:$0xff] (!%p236_p2), %v1024_v1  ;;  %315 = vst [vmem:[#allocation2 + $0x48] sm:$0xff] (!%p236_p2), %v1024_v1  ;;  %vm416_vm7 = vcmask (!%p236_p2), 1043576   ;;  %vm412_vm8 = vcmask (!%p236_p2), 121856   ;;  %vm387_vm9 = vcmask (!%p236_p2), 138240   ;;  %vm425_vm10 = vcmask (!%p236_p2), 7168  }
   0xb   : > { %316 = vst [vmem:[#allocation2 + $0x50] sm:$0xff] (!%p236_p2), %v1024_v1  ;;  %317 = vst [vmem:[#allocation2 + $0x58] sm:$0xff] (!%p236_p2), %v1024_v1  ;;  %vm1092_vm0 = vcmp.le.s32.totalorder (!%p236_p2), %v342_v3, 14  ;;  %vm1096_vm1 = vcmp.ge.s32.totalorder (!%p236_p2), %v342_v3, 1  ;;  %v349_v8 = vand.u32 (!%p236_p2), 15, %v337_v4  ;;  %vm429_vm11 = vcmask (!%p236_p2), 1047564  }
   0xc   : > { %318 = vst [vmem:[#allocation2 + $0x60] sm:$0xff] (!%p236_p2), %v1024_v1  ;;  %319 = vst [vmem:[#allocation2 + $0x68] sm:$0xff] (!%p236_p2), %v1024_v1  ;;  %vm445_vm12 = vcmask (!%p236_p2), 1039364   ;;  %vm440_vm13 = vcmask (!%p236_p2), 1039360   ;;  %vm456_vm14 = vcmask (!%p236_p2), 920576   ;;  %vm451_vm15 = vcmask (!%p236_p2), 924672  }
   0xd   : > { %320 = vst [vmem:[#allocation2 + $0x70] sm:$0xff] %v1024_v1  ;;  %321 = vst [vmem:[#allocation2 + $0x78] sm:$0xff] %v1024_v1  ;;  %s1228_s22 = smov (!%p1079_p3, %s913_s22), 1  ;;  %vm1110_vm2 = vcmp.ge.s32.totalorder %v349_v8, 1  ;;  %vm1114_vm3 = vcmp.le.s32.totalorder %v349_v8, 14 }
   0xe   : > { %322 = vst [vmem:[#allocation2 + $0x80] sm:$0xff] %v1024_v1  ;;  %323 = vst [vmem:[#allocation2 + $0x88] sm:$0xff] %v1024_v1  ;;  %s941_s24 = sshll.u32 %s1228_s22, 3  ;;  %s1087_s25 = sshll.u32 %s1228_s22, 4 }
   0xf   : > { %324 = vst [vmem:[#allocation2 + $0x90] sm:$0xff] %v1024_v1  ;;  %325 = vst [vmem:[#allocation2 + $0x98] sm:$0xff] %v1024_v1  ;;  %s284_s28 = scalar_lea.vmem %s1209_s0, %s941_s24  ;;  %s289_s8 = scalar_lea.vmem %s1210_s1, %s1087_s25 }
  0x10   : > { %326 = vst [vmem:[#allocation2 + $0xa0] sm:$0xff] %v1024_v1  ;;  %327 = vst [vmem:[#allocation2 + $0xa8] sm:$0xff] %v1024_v1  ;;  %v334_v5 = vld [vmem:[%s284_s28] sm:$0xff]  ;;  %v481_v16 = vld [vmem:[%s289_s8 + $0x8] sm:$0xff] }
  0x11   : > { %328 = vst [vmem:[#allocation2 + $0xb0] sm:$0xff] %v1024_v1  ;;  %329 = vst [vmem:[#allocation2 + $0xb8] sm:$0xff] %v1024_v1  ;;  %397 = vrot.lane.b32.xlu1 %v334_v5, %s1025_s29  ;;  %v371_v9 = vsel %vm1092_vm0, %v334_v5, 0.0  ;;  %v394_v10 = vcombine.low %v334_v5, %v334_v5  ;;  %v369_v11 = vcombine.high %v334_v5, %v334_v5  ;;  %v379_v12 = vsel %vm1096_vm1, %v334_v5, 0.0  ;;  %v480_v15 = vld [vmem:[%s289_s8] sm:$0xff]  ;;  %s294_s8 = scalar_lea.vmem %s1211_s2, %s1087_s25 }
  0x12   : > { %330 = vst [vmem:[#allocation2 + $0xc0] sm:$0xff] %v1024_v1  ;;  %331 = vst [vmem:[#allocation2 + $0xc8] sm:$0xff] %v1024_v1  ;;  %383 = vrot.lane.b32.xlu0 %v371_v9, %s1026_s9  ;;  %v505_v17 = vrot.slane %v481_v16, 4  ;;  %v504_v18 = vrot.slane %v480_v15, 4  ;;  %v419_v22 = vrot.slane %v371_v9, 4  ;;  %v434_v24 = vrot.slane %v379_v12, 4 }
  0x13   : > { %332 = vst [vmem:[#allocation2 + $0xd0] sm:$0xf] %v1024_v1  ;;  %333 = vst [vmem:[#allocation2 + $0xd8] sm:$0xf] %v1024_v1  ;;  %v380_v19 = vsel %vm1110_vm2, %v369_v11, 0.0  ;;  %v372_v20 = vsel %vm1114_vm3, %v369_v11, 0.0 }
  0x14   : > { %432 = vst [vmem:[#allocation2 + $0x20] sm:$0xf] %v334_v5  ;;  %433 = vst [vmem:[#allocation2 + $0x28] sm:$0xf] %v369_v11  ;;  %v420_v21 = vrot.slane %v372_v20, 4  ;;  %v435_v23 = vrot.slane %v380_v19, 4 }
  0x15   : > { %395 = vrot.lane.b32.xlu1 %v394_v10, %s1025_s29  ;;  %548 = vst [vmem:[#allocation2 + $0x90] ss:$-12 sps:$4 sm:$0xff] %v504_v18   ;;  %549 = vst [vmem:[#allocation2 + $0x98] ss:$-12 sps:$4 sm:$0xff] %v505_v17   ;;  %v483_v25 = vsel %vm1114_vm3, %v481_v16, 0.0  ;;  %v482_v26 = vsel %vm1092_vm0, %v480_v15, 0.0 }
  0x16   : > { %408 = vrot.lane.b32.xlu0 %v379_v12, %s1027_s10  ;;  %v489_v27 = vrot.slane %v483_v25, 4  ;;  %v488_v28 = vrot.slane %v482_v26, 4  ;;  %v485_v29 = vsel %vm1110_vm2, %v481_v16, 0.0  ;;  %v484_v30 = vsel %vm1096_vm1, %v480_v15, 0.0 }
  0x17   : > { %v521_v31 = vrot.slane %v485_v29, 4  ;;  %v520_v32 = vrot.slane %v484_v30, 4  ;;  %vm467_vm0 = vcmask 916484   ;;  %vm1216_vm1 = vcmask 916480  }
  0x18   : > { %vm497_vm2 = vcmask 1047692   ;;  %vm515_vm3 = vcmask 1043584  }
  0x19   : > { %410 = vrot.lane.b32.xlu1 %v380_v19, %s1027_s10 }
  0x1a   : > { %385 = vrot.lane.b32.xlu0 %v372_v20, %s1026_s9 }
  0x1d   : > { %423 = vrot.lane.b32.xlu1 %v420_v21, %s1028_s11 }
  0x1e   : > { %421 = vrot.lane.b32.xlu0 %v419_v22, %s1028_s11 }
  0x21   : > { %438 = vrot.lane.b32.xlu1 %v435_v23, %s1029_s12 }
  0x22   : > { %436 = vrot.lane.b32.xlu0 %v434_v24, %s1029_s12 }
  0x25   : > { %449 = vrot.lane.b32.xlu1 %v372_v20, %s1030_s13 }
  0x26   : > { %447 = vrot.lane.b32.xlu0 %v371_v9, %s1030_s13 }
  0x29   : > { %460 = vrot.lane.b32.xlu1 %v334_v5, %s1031_s14 }
  0x2a   : > { %458 = vrot.lane.b32.xlu0 %v394_v10, %s1031_s14 }
  0x2d   : > { %492 = vrot.lane.b32.xlu1 %v489_v27, %s1026_s9 }
  0x2e   : > { %490 = vrot.lane.b32.xlu0 %v488_v28, %s1026_s9 }
  0x31   : > { %508 = vrot.lane.b32.xlu1 %v505_v17, %s1025_s29 }
  0x32   : > { %506 = vrot.lane.b32.xlu0 %v504_v18, %s1025_s29 }
  0x35   : > { %471 = vrot.lane.b32.xlu1 %v380_v19, %s1032_s15 }
  0x36   : > { %469 = vrot.lane.b32.xlu0 %v379_v12, %s1032_s15 }
  0x39   : > { %524 = vrot.lane.b32.xlu1 %v521_v31, %s1027_s10 }
  0x3a   : > { %522 = vrot.lane.b32.xlu0 %v520_v32, %s1027_s10 }
  0x3d   : > { %536 = vrot.lane.b32.xlu1 %v489_v27, %s1028_s11 }
  0x3e   : > { %534 = vrot.lane.b32.xlu0 %v488_v28, %s1028_s11  ;;  %s304_s11 = scalar_lea.vmem %s1215_s6, %s1087_s25 }
  0x41   : > { %554 = vrot.lane.b32.xlu1 %v521_v31, %s1029_s12 }
  0x42   : > { %552 = vrot.lane.b32.xlu0 %v520_v32, %s1029_s12 }
  0x45   : > { %566 = vrot.lane.b32.xlu1 %v489_v27, %s1030_s13 }
  0x46   : > { %564 = vrot.lane.b32.xlu0 %v488_v28, %s1030_s13 }
  0x49   : > { %578 = vrot.lane.b32.xlu1 %v505_v17, %s1031_s14 }
  0x4a   : > { %576 = vrot.lane.b32.xlu0 %v504_v18, %s1031_s14  ;;  %s299_s14 = scalar_lea.vmem %s1214_s5, %s1087_s25 }
  0x4d   : > { %590 = vrot.lane.b32.xlu1 %v521_v31, %s1032_s15 }
  0x4e   : > { %588 = vrot.lane.b32.xlu0 %v520_v32, %s1032_s15 }
  0x51   : > { %657 = vperm.xlu1 %979, %v647_v35  }
  0x52   : > { %652 = vperm.xlu0 %978, %v646_v34  }
  0x55   : > { %662 = vperm.xlu1 %979, %v648_v36  }
  0x56   : > { %667 = vperm.xlu0 %978, %v649_v37  }
  0x83   : > { %v398_v38 = vpop.permute.xlu1 %397 }
  0x84   : > { %v384_v39 = vpop.permute.xlu0 %383 }
  0x85   : > { %392 = vst.msk [vmem:[#allocation2] sm:$0xf] %vm391_vm4, %v384_v39 }
  0x87   : > { %v396_v40 = vpop.permute.xlu1 %395 }
  0x88   : > { %v400_v41 = vsel %vm399_vm5, %v396_v40, %v398_v38  ;;  %404 = vst.msk [vmem:[#allocation2] sm:$0xf0] %vm403_vm6, %v396_v40  ;;  %v409_v42 = vpop.permute.xlu0 %408 }
  0x89   : > { %405 = vst [vmem:[#allocation2 + $0x8] sm:$0xf0] %v400_v41  ;;  %417 = vst.msk [vmem:[#allocation2 + $0x10] sm:$0xf] %vm416_vm7, %v409_v42 }
  0x8b   : > { %v411_v43 = vpop.permute.xlu1 %410 }
  0x8c   : > { %v413_v44 = vsel %vm412_vm8, %v409_v42, %v411_v43  ;;  %v386_v45 = vpop.permute.xlu0 %385 }
  0x8d   : > { %418 = vst [vmem:[#allocation2 + $0x18] sm:$0xf] %v413_v44  ;;  %v388_v46 = vsel %vm387_vm9, %v384_v39, %v386_v45 }
  0x8e   : > { %393 = vst [vmem:[#allocation2 + $0x8] sm:$0xf] %v388_v46 }
  0x8f   : > { %v424_v47 = vpop.permute.xlu1 %423  ;;  %v604_v60 = vld [vmem:[#allocation2] sm:$0xff] }
  0x90   : > { %v422_v48 = vpop.permute.xlu0 %421 }
  0x91   : > { %v426_v49 = vsel %vm425_vm10, %v422_v48, %v424_v47  ;;  %430 = vst.msk [vmem:[#allocation2 + $0x10] sm:$0xf0] %vm429_vm11, %v422_v48 }
  0x92   : > { %431 = vst [vmem:[#allocation2 + $0x18] sm:$0xf0] %v426_v49 }
  0x93   : > { %v439_v50 = vpop.permute.xlu1 %438 }
  0x94   : > { %446 = vst.msk [vmem:[#allocation2 + $0x28] sm:$0xf0] %vm445_vm12, %v439_v50  ;;  %v437_v51 = vpop.permute.xlu0 %436 }
  0x95   : > { %v441_v52 = vsel %vm440_vm13, %v437_v51, %v439_v50  ;;  %v605_v57 = vld [vmem:[#allocation2 + $0x8] sm:$0xff] }
  0x96   : > { %444 = vst [vmem:[#allocation2 + $0x20] sm:$0xf0] %v441_v52 }
  0x97   : > { %v450_v53 = vpop.permute.xlu1 %449 }
  0x98   : > { %457 = vst.msk [vmem:[#allocation2 + $0x38] sm:$0xf] %vm456_vm14, %v450_v53  ;;  %v448_v54 = vpop.permute.xlu0 %447  ;;  %v606_v55 = vld [vmem:[#allocation2 + $0x10] sm:$0xff] }
  0x99   : > { %v452_v56 = vsel %vm451_vm15, %v448_v54, %v450_v53  ;;  %v607_v58 = vld [vmem:[#allocation2 + $0x18] sm:$0xff]  ;;  %v632_v62 = vpack.c.bf16 %v606_v55, %v604_v60 }
  0x9a   : > { %455 = vst [vmem:[#allocation2 + $0x30] sm:$0xf] %v452_v56  ;;  %v633_v59 = vpack.c.bf16 %v607_v58, %v605_v57 }
  0x9b   : > { %v461_v61 = vpop.permute.xlu1 %460  ;;  %v609_v5 = vld [vmem:[#allocation2 + $0x28] sm:$0xff] }
  0x9c   : > { %468 = vst.msk [vmem:[#allocation2 + $0x38] sm:$0xf0] %vm467_vm0, %v461_v61  ;;  %v459_v63 = vpop.permute.xlu0 %458  ;;  %694 = vmatprep.subr.bf16.mxu0 %v633_v59  ;;  %946 = vmatprep.subr.bf16.mxu1 %v633_v59 }
  0x9d   : > { %v463_v0 = vsel %vm1216_vm1, %v459_v63, %v461_v61  ;;  %695 = vmatpush1.bf16.msra.mxu0 %v632_v62  ;;  %953 = vmatpush1.bf16.msra.mxu1 %v632_v62  ;;  %vm478_vm1 = vcmask 904192   ;;  %v608_v10 = vld [vmem:[#allocation2 + $0x20] sm:$0xff] }
  0x9e   : > { %466 = vst [vmem:[#allocation2 + $0x30] sm:$0xf0] %v463_v0 }
  0x9f   : > { %v493_v1 = vpop.permute.xlu1 %492 }
  0xa0   : > { %v491_v2 = vpop.permute.xlu0 %490 }
  0xa1   : > { %v494_v3 = vsel %vm387_vm9, %v491_v2, %v493_v1  ;;  %498 = vst.msk [vmem:[#allocation2 + $0x40] sm:$0xf0] %vm497_vm2, %v491_v2  ;;  %vm473_vm9 = vcmask 908288   ;;  %v982_v1 = vld [vmem:[%s1212_s3] sm:$0xff]  }
  0xa2   : > { %500 = vst.msk [vmem:[#allocation2 + $0x50] sm:$0xf] %vm391_vm4, %v491_v2  ;;  %501 = vst [vmem:[#allocation2 + $0x58] ss:$-12 sps:$4 sm:$0xff] %v494_v3   ;;  %vm529_vm4 = vcmask 1047676   ;;  %v983_v2 = vld [vmem:[%s1212_s3 + $0x8] sm:$0xff]  }
  0xa3   : > { %v509_v4 = vpop.permute.xlu1 %508  ;;  %v611_v6 = vld [vmem:[#allocation2 + $0x38] sm:$0xff] }
  0xa4   : > { %v507_v7 = vpop.permute.xlu0 %506  ;;  %v635_v8 = vpack.c.bf16 %v611_v6, %v609_v5 }
  0xa5   : > { %v510_v9 = vsel %vm399_vm5, %v507_v7, %v509_v4  ;;  %513 = vst.msk [vmem:[#allocation2 + $0x50] sm:$0xf0] %vm403_vm6, %v507_v7  ;;  %v610_v11 = vld [vmem:[#allocation2 + $0x30] sm:$0xff]  ;;  %vm543_vm5 = vcmask 1043464   ;;  %vm562_vm6 = vcmask 1035264  }
  0xa6   : > { %516 = vst.msk [vmem:[#allocation2 + $0x60] sm:$0xf] %vm515_vm3, %v507_v7  ;;  %514 = vst [vmem:[#allocation2 + $0x68] ss:$-12 sps:$4 sm:$0xff] %v510_v9   ;;  %696 = vmatprep.subr.bf16.mxu0 %v635_v8  ;;  %947 = vmatprep.subr.bf16.mxu1 %v635_v8  ;;  %v634_v12 = vpack.c.bf16 %v610_v11, %v608_v10 }
  0xa7   : > { %v472_v13 = vpop.permute.xlu1 %471 }
  0xa8   : > { %479 = vst.msk [vmem:[#allocation2 + $0x48] sm:$0xf] %vm478_vm1, %v472_v13  ;;  %v470_v14 = vpop.permute.xlu0 %469  ;;  %697 = vmatpush1.bf16.msra.mxu0 %v634_v12  ;;  %954 = vmatpush1.bf16.msra.mxu1 %v634_v12 }
  0xa9   : > { %v474_v15 = vsel %vm473_vm9, %v470_v14, %v472_v13 }
  0xaa   : > { %477 = vst [vmem:[#allocation2 + $0x40] sm:$0xf] %v474_v15 }
  0xab   : > { %v525_v16 = vpop.permute.xlu1 %524 }
  0xac   : > { %v523_v17 = vpop.permute.xlu0 %522  ;;  %v614_v26 = vld [vmem:[#allocation2 + $0x50] sm:$0xff] }
  0xad   : > { %v526_v18 = vsel %vm412_vm8, %v523_v17, %v525_v16  ;;  %530 = vst.msk [vmem:[#allocation2 + $0x60] sm:$0xf0] %vm529_vm4, %v523_v17  ;;  %v615_v21 = vld [vmem:[#allocation2 + $0x58] sm:$0xff]  ;;  %vm586_vm8 = vcmask 912384  }
  0xae   : > { %532 = vst.msk [vmem:[#allocation2 + $0x70] sm:$0xf] %vm416_vm7, %v523_v17  ;;  %531 = vst [vmem:[#allocation2 + $0x78] ss:$-12 sps:$4 sm:$0xff] %v526_v18   ;;  %vm572_vm7 = vcmask 924676  }
  0xaf   : > { %v537_v19 = vpop.permute.xlu1 %536  ;;  %v613_v20 = vld [vmem:[#allocation2 + $0x48] sm:$0xff] }
  0xb0   : > { %v535_v22 = vpop.permute.xlu0 %534  ;;  %v637_v23 = vpack.c.bf16 %v615_v21, %v613_v20 }
  0xb1   : > { %v538_v24 = vsel %vm425_vm10, %v535_v22, %v537_v19  ;;  %541 = vst.msk [vmem:[#allocation2 + $0x70] sm:$0xf0] %vm429_vm11, %v535_v22  ;;  %v612_v25 = vld [vmem:[#allocation2 + $0x40] sm:$0xff]  ;;  %vm1226_vm10 = vcmask 916480   ;;  %vm596_vm11 = vcmask 908292  }
  0xb2   : > { %544 = vst.msk [vmem:[#allocation2 + $0x80] sm:$0xf] %vm543_vm5, %v535_v22  ;;  %542 = vst [vmem:[#allocation2 + $0x88] ss:$-12 sps:$4 sm:$0xff] %v538_v24   ;;  %698 = vmatprep.subr.bf16.mxu0 %v637_v23  ;;  %948 = vmatprep.subr.bf16.mxu1 %v637_v23  ;;  %v636_v27 = vpack.c.bf16 %v614_v26, %v612_v25 }
  0xb3   : > { %v555_v28 = vpop.permute.xlu1 %554 }
  0xb4   : > { %560 = vst.msk [vmem:[#allocation2 + $0x98] sm:$0xf0] %vm445_vm12, %v555_v28  ;;  %v553_v29 = vpop.permute.xlu0 %552  ;;  %699 = vmatpush1.bf16.msra.mxu0 %v636_v27  ;;  %955 = vmatpush1.bf16.msra.mxu1 %v636_v27  ;;  %v616_v38 = vld [vmem:[#allocation2 + $0x60] sm:$0xff]  ;;  %vm687_vm12 = vcmask 1045504  }
  0xb5   : > { %563 = vst.msk [vmem:[#allocation2 + $0xa8] sm:$0xf] %vm562_vm6, %v555_v28  ;;  %v556_v30 = vsel %vm440_vm13, %v553_v29, %v555_v28  ;;  %v617_v35 = vld [vmem:[#allocation2 + $0x68] sm:$0xff]  ;;  %vm680_vm13 = vcmask 883712  }
  0xb6   : > { %559 = vst [vmem:[#allocation2 + $0xa0] ss:$-12 sps:$4 sm:$0xff] %v556_v30  }
  0xb7   : > { %v567_v31 = vpop.permute.xlu1 %566 }
  0xb8   : > { %573 = vst.msk [vmem:[#allocation2 + $0xa8] sm:$0xf0] %vm572_vm7, %v567_v31  ;;  %v565_v32 = vpop.permute.xlu0 %564  ;;  %v618_v33 = vld [vmem:[#allocation2 + $0x70] sm:$0xff] }
  0xb9   : > { %575 = vst.msk [vmem:[#allocation2 + $0xb8] sm:$0xf] %vm456_vm14, %v567_v31  ;;  %v568_v34 = vsel %vm451_vm15, %v565_v32, %v567_v31  ;;  %v619_v36 = vld [vmem:[#allocation2 + $0x78] sm:$0xff]  ;;  %v638_v40 = vpack.c.bf16 %v618_v33, %v616_v38  ;;  %v621_v41 = vld [vmem:[#allocation2 + $0x88] sm:$0xff]  ;;  %v620_v46 = vld [vmem:[#allocation2 + $0x80] sm:$0xff] }
  0xba   : > { %571 = vst [vmem:[#allocation2 + $0xb0] ss:$-12 sps:$4 sm:$0xff] %v568_v34   ;;  %v639_v37 = vpack.c.bf16 %v619_v36, %v617_v35 }
  0xbb   : > { %v579_v39 = vpop.permute.xlu1 %578  ;;  %v623_v42 = vld [vmem:[#allocation2 + $0x98] sm:$0xff] }
  0xbc   : > { %584 = vst.msk [vmem:[#allocation2 + $0xb8] sm:$0xf0] %vm467_vm0, %v579_v39  ;;  %v577_v43 = vpop.permute.xlu0 %576  ;;  %700 = vmatprep.subr.bf16.mxu0 %v639_v37  ;;  %949 = vmatprep.subr.bf16.mxu1 %v639_v37  ;;  %v641_v44 = vpack.c.bf16 %v623_v42, %v621_v41  ;;  %v785_v41 = vld [vmem:[%s294_s8] sm:$0xff] }
  0xbd   : > { %587 = vst.msk [vmem:[#allocation2 + $0xc8] sm:$0xf] %vm586_vm8, %v579_v39  ;;  %v580_v45 = vsel %vm1226_vm10, %v577_v43, %v579_v39  ;;  %701 = vmatpush1.bf16.msra.mxu0 %v638_v40  ;;  %956 = vmatpush1.bf16.msra.mxu1 %v638_v40  ;;  %v622_v47 = vld [vmem:[#allocation2 + $0x90] sm:$0xff] }
  0xbe   : > { %583 = vst [vmem:[#allocation2 + $0xc0] ss:$-12 sps:$4 sm:$0xff] %v580_v45   ;;  %702 = vmatprep.subr.bf16.mxu0 %v641_v44  ;;  %950 = vmatprep.subr.bf16.mxu1 %v641_v44  ;;  %v640_v48 = vpack.c.bf16 %v622_v47, %v620_v46  ;;  %v786_v44 = vld [vmem:[%s294_s8 + $0x8] sm:$0xff] }
  0xbf   : > { %v591_v49 = vpop.permute.xlu1 %590  ;;  %v625_v52 = vld [vmem:[#allocation2 + $0xa8] sm:$0xff] }
  0xc0   : > { %597 = vst.msk [vmem:[#allocation2 + $0xc8] sm:$0xf0] %vm596_vm11, %v591_v49  ;;  %v589_v50 = vpop.permute.xlu0 %588 }
  0xc1   : > { %599 = vst.msk [vmem:[#allocation2 + $0xd8] sm:$0xf] %vm478_vm1, %v591_v49  ;;  %v592_v51 = vsel %vm473_vm9, %v589_v50, %v591_v49  ;;  %703 = vmatpush1.bf16.msra.mxu0 %v640_v48  ;;  %957 = vmatpush1.bf16.msra.mxu1 %v640_v48  ;;  %v624_v55 = vld [vmem:[#allocation2 + $0xa0] sm:$0xff] }
  0xc2   : > { %595 = vst [vmem:[#allocation2 + $0xd0] ss:$-12 sps:$4 sm:$0xff] %v592_v51  }
  0xc3   : > { %v627_v53 = vld [vmem:[#allocation2 + $0xb8] sm:$0xff] }
  0xc4   : > { %v643_v54 = vpack.c.bf16 %v627_v53, %v625_v52 }
  0xc5   : > { %v626_v56 = vld [vmem:[#allocation2 + $0xb0] sm:$0xff] }
  0xc6   : > { %704 = vmatprep.subr.bf16.mxu0 %v643_v54  ;;  %951 = vmatprep.subr.bf16.mxu1 %v643_v54  ;;  %v642_v57 = vpack.c.bf16 %v626_v56, %v624_v55 }
  0xc7   : > { %v629_v58 = vld [vmem:[#allocation2 + $0xc8] sm:$0xff] }
  0xc8   : > { %v631_v59 = vld [vmem:[#allocation2 + $0xd8] sm:$0xf]  ;;  %705 = vmatpush1.bf16.msra.mxu0 %v642_v57  ;;  %958 = vmatpush1.bf16.msra.mxu1 %v642_v57 }
  0xc9   : > { %v645_v60 = vpack.c.bf16 %v631_v59, %v629_v58  ;;  %v628_v61 = vld [vmem:[#allocation2 + $0xc0] sm:$0xff]  ;;  %v630_v62 = vld [vmem:[#allocation2 + $0xd0] sm:$0xf] }
  0xca   : > { %v644_v63 = vpack.c.bf16 %v630_v62, %v628_v61 }
  0xcb   : > { %930 = vmatprep.subr.msk.bf16.mxu0 %vm687_vm12, %v645_v60  ;;  %952 = vmatprep.subr.msk.bf16.mxu1 %vm687_vm12, %v645_v60 }
  0xcc   : > { %v689_v0 = vsel %vm687_vm12, %v644_v63, 0 }
  0xcd   : > { %707 = vmatpush1.bf16.msra.mxu0 %v689_v0  ;;  %959 = vmatpush1.bf16.msra.mxu1 %v689_v0 }
  0xd0   : > { %931 = vmatmul.mubr.msk.bf16.vlgmr.msra.gmra.mrb[0].mxu0 %vm680_vm13, %v982_v1  ;;  %932 = vmatmul.mubr.msk.bf16.vlgmr.msra.gmra.mrb[0].mxu1 %vm680_vm13, %v983_v2  ;;  %v658_v4 = vpop.permute.xlu1 %657 }
  0xd1   : > { %v653_v3 = vpop.permute.xlu0 %652 }
  0xd4   : > { %v663_v20 = vpop.permute.xlu1 %662 }
  0xd5   : > { %v668_v22 = vpop.permute.xlu0 %667 }
 0x1a3   : > { %v728_v5 = vpop.f32.mrb[0].mxu0  ;;  %v738_v6 = vpop.f32.mrb[0].mxu1 }
 0x1a4   : > { %v729_v7 = vadd.f32 %v728_v5, %v653_v3  ;;  %v730_v8 = vpop.f32.mrb[1].mxu0  ;;  %v740_v9 = vpop.f32.mrb[1].mxu1  ;;  %v739_v23 = vadd.f32 %v738_v6, %v663_v20 }
 0x1a5   : > { %v731_v10 = vadd.f32 %v730_v8, %v653_v3  ;;  %v732_v11 = vpop.f32.mrb[2].mxu0  ;;  %v742_v12 = vpop.f32.mrb[2].mxu1  ;;  %v741_v24 = vadd.f32 %v740_v9, %v663_v20 }
 0x1a6   : > { %v933_v13 = vmul.f32 -1.442695, %v729_v7  ;;  %v733_v14 = vadd.f32 %v732_v11, %v658_v4  ;;  %v734_v15 = vpop.f32.mrb[3].mxu0  ;;  %v744_v16 = vpop.f32.mrb[3].mxu1  ;;  %v743_v25 = vadd.f32 %v742_v12, %v668_v22  ;;  %v937_v26 = vmul.f32 -1.442695, %v739_v23 }
 0x1a7   : > { %v934_v17 = vmul.f32 -1.442695, %v731_v10  ;;  %v735_v18 = vadd.f32 %v734_v15, %v658_v4  ;;  %v938_v27 = vmul.f32 -1.442695, %v741_v24  ;;  %v745_v33 = vadd.f32 %v744_v16, %v668_v22 }
 0x1a8   : > { %984 = vpow2.f32 %v933_v13  ;;  %v935_v19 = vmul.f32 -1.442695, %v733_v14 }
 0x1a9   : > { %986 = vpow2.f32 %v934_v17  ;;  %v936_v21 = vmul.f32 -1.442695, %v735_v18 }
 0x1aa   : > { %988 = vpow2.f32 %v935_v19 }
 0x1ab   : > { %990 = vpow2.f32 %v936_v21 }
 0x1ac   : > { %992 = vtanh.f32 %v743_v25 }
 0x1ad   : > { %994 = vpow2.f32 %v937_v26 }
 0x1ae   : > { %996 = vpow2.f32 %v938_v27 }
 0x1b2   : > { %v985_v28 = vpop.eup %984 }
 0x1b3   : > { %v987_v29 = vpop.eup %986  ;;  %v753_v30 = vadd.f32 1.0, %v985_v28 }
 0x1b4   : > { %v989_v31 = vpop.eup %988  ;;  %v754_v32 = vadd.f32 1.0, %v987_v29 }
 0x1b5   : > { %998 = vrcp.f32 %v753_v30  ;;  %v765_v34 = vadd.f32 1.0, %v989_v31  ;;  %v991_v35 = vpop.eup %990 }
 0x1b6   : > { %1000 = vrcp.f32 %v754_v32  ;;  %v766_v36 = vadd.f32 1.0, %v991_v35  ;;  %v993_v37 = vpop.eup %992 }
 0x1b7   : > { %1002 = vrcp.f32 %v765_v34  ;;  %v995_v38 = vpop.eup %994 }
 0x1b8   : > { %1004 = vtanh.f32 %v745_v33  ;;  %v997_v39 = vpop.eup %996  ;;  %v777_v45 = vadd.f32 1.0, %v995_v38 }
 0x1b9   : > { %1006 = vrcp.f32 %v766_v36  ;;  %v778_v50 = vadd.f32 1.0, %v997_v39 }
 0x1ba   : > { %1008 = vrcp.f32 %v777_v45 }
 0x1bf   : > { %v999_v40 = vpop.eup %998 }
 0x1c0   : > { %v1001_v42 = vpop.eup %1000  ;;  %v787_v47 = vmul.f32 %v999_v40, %v785_v41 }
 0x1c1   : > { %v1003_v43 = vpop.eup %1002  ;;  %v788_v51 = vmul.f32 %v1001_v42, %v786_v44 }
 0x1c2   : > { %v1005_v46 = vpop.eup %1004  ;;  %v789_v48 = vmul.f32 %v1003_v43, %v993_v37 }
 0x1c3   : > { %v1007_v49 = vpop.eup %1006 }
 0x1c4   : > { %v791_v52 = vadd.f32 %v789_v48, %v787_v47  ;;  %v790_v53 = vmul.f32 %v1007_v49, %v1005_v46  ;;  %v1009_v55 = vpop.eup %1008 }
 0x1c6   : > { %1010 = vtanh.f32 %v791_v52  ;;  %799 = vst [vmem:[%s304_s11] sm:$0xff] %v791_v52  ;;  %v792_v54 = vadd.f32 %v790_v53, %v788_v51 }
 0x1c7   : > { %1012 = vrcp.f32 %v778_v50 }
 0x1c8   : > { %1014 = vtanh.f32 %v792_v54  ;;  %800 = vst [vmem:[%s304_s11 + $0x8] sm:$0xff] %v792_v54 }
 0x1d0   : > { %v1011_v56 = vpop.eup %1010 }
 0x1d1   : > { %v1013_v57 = vpop.eup %1012  ;;  %v795_v58 = vmul.f32 %v1011_v56, %v1009_v55 }
 0x1d2   : > { %v1015_v59 = vpop.eup %1014 }
 0x1d3   : > { %v796_v60 = vmul.f32 %v1015_v59, %v1013_v57  ;;  %797 = vst [vmem:[%s299_s14] sm:$0xff] %v795_v58 }
 0x1d5   : > { %798 = vst [vmem:[%s299_s14 + $0x8] sm:$0xff] %v796_v60 }
 0x1d6 PF: > { %s17_s21 = sadd.s32 1, %s1022_s21  }
 0x1d7   : > { %p14_p4 = scmp.ge.s32.totalorder %s17_s21, 4  }
 0x1d9   :  { %16 = sbr.rel (!%p14_p4) target bundleno = 1 (0x1), region = 88 }

</bundles_post_ra>
